<compile_context>
chip_gen: v5e
topology: v5e:2x2
jax: 0.10.0
libtpu: 0.0.40
codegen_flags: <defaults>
</compile_context>

<pallas_src>
import jax
import jax.numpy as jnp
from jax import lax
from jax.experimental import pallas as pl
from jax.experimental.pallas import tpu as pltpu


# ----------------------------- small helpers --------------------------------
def _round_up(a, m):
    return (a + m - 1) // m * m


def _cdiv(a, b):
    return -(-a // b)


def _gelu_exact(x):
    # PyTorch nn.GELU() default: exact erf-based GELU (f32 math).
    return 0.5 * x * (1.0 + lax.erf(x * 0.7071067811865476))


def _vmem_capacity_bytes():
    try:
        return int(pltpu.get_tpu_info().vmem_capacity_bytes)
    except Exception:
        return 128 << 20  # conservative default (v5e/v6e)


def _num_tensorcores():
    # Best-effort TC-per-chip detection (v7x has 2). Defaults to 1, which is
    # always safe (just a missed megacore-specific tiling tweak).
    try:
        info = pltpu.get_tpu_info()
        for attr in ("num_cores", "tensorcore_count", "num_tensorcores", "cores_per_chip"):
            v = getattr(info, attr, None)
            if v:
                return int(v)
    except Exception:
        pass
    try:
        return int(getattr(jax.devices()[0], "num_cores", 1) or 1)
    except Exception:
        return 1


def _choose_tile_b(batch, num_cores=1):
    # Small batches: one lane/sublane-aligned step (no pointless grid split on
    # single-TC v5e/v6e; per-step overhead ~0.35us paid once).
    # Large batches: 512-row tiles amortize per-step overhead / weight reuse.
    b8 = _round_up(max(batch, 1), 8)
    if num_cores > 1:
        if b8 <= 256:
            return b8
        if b8 <= 1024:
            return _round_up(_cdiv(b8, 2), 8)  # >=2 steps so both TCs get work
        return 512
    if b8 <= 512:
        return b8
    return 512


# ------------------------------- kernel --------------------------------------
def mlp_kernel(x_ref, w1_ref, b1_ref, w2_ref, b2_ref, w3_ref, b3_ref, o_ref):
    # Cast x to the MXU compute dtype in-kernel (cheap VPU op) so the wrapper
    # never has to materialize a casted copy of x.
    x = x_ref[...].astype(w1_ref.dtype)
    # fc1 + GELU (bf16 operands, f32 accumulate, f32 activation math)
    h = jnp.dot(x, w1_ref[...], preferred_element_type=jnp.float32) + b1_ref[...]
    h = _gelu_exact(h)
    # fc2 + GELU
    h = jnp.dot(h.astype(w2_ref.dtype), w2_ref[...],
                preferred_element_type=jnp.float32) + b2_ref[...]
    h = _gelu_exact(h)
    # fc3
    y = jnp.dot(h.astype(w3_ref.dtype), w3_ref[...],
                preferred_element_type=jnp.float32) + b3_ref[...]
    o_ref[...] = y.astype(o_ref.dtype)


# --------------------------- weight preparation -------------------------------
def prepare_mlp_params(w1, b1, w2, b2, w3, b3, compute_dtype=jnp.bfloat16):
    """One-time pad (to lane-dense multiples of 128) + cast of weights/biases.

    Pad lanes are zero so GELU(0)=0 keeps padded columns inert end-to-end;
    the forward result is numerically identical to the unpadded computation.
    """
    Din, Dh = w1.shape
    Dout = w3.shape[1]
    Din_p = _round_up(Din, 128)
    Dh_p = _round_up(Dh, 128)
    Dout_p = _round_up(Dout, 128)

    w1p = jnp.pad(w1, ((0, Din_p - Din), (0, Dh_p - Dh))).astype(compute_dtype)
    w2p = jnp.pad(w2, ((0, Dh_p - Dh), (0, Dh_p - Dh))).astype(compute_dtype)
    w3p = jnp.pad(w3, ((0, Dh_p - Dh), (0, Dout_p - Dout))).astype(compute_dtype)
    # Biases stay f32 (added to the f32 accumulators); padded lanes are zero.
    b1p = jnp.pad(b1, (0, Dh_p - Dh)).reshape(1, Dh_p).astype(jnp.float32)
    b2p = jnp.pad(b2, (0, Dh_p - Dh)).reshape(1, Dh_p).astype(jnp.float32)
    b3p = jnp.pad(b3, (0, Dout_p - Dout)).reshape(1, Dout_p).astype(jnp.float32)

    meta = dict(Din=Din, Dh=Dh, Dout=Dout,
                Din_p=Din_p, Dh_p=Dh_p, Dout_p=Dout_p,
                compute_dtype=compute_dtype)
    return (w1p, b1p, w2p, b2p, w3p, b3p), meta


# ------------------------------- entry points ---------------------------------
def mlp_pallas_prepared(x, params, meta, *, tile_b=None, out_dtype=None):
    """Steady-state entry point: weights/biases already padded + cast once."""
    w1p, b1p, w2p, b2p, w3p, b3p = params
    B, Din = x.shape
    assert Din == meta["Din"], "x feature dim does not match prepared params"
    Din_p, Dh_p, Dout_p = meta["Din_p"], meta["Dh_p"], meta["Dout_p"]
    Dout = meta["Dout"]
    compute_dtype = meta["compute_dtype"]
    out_dtype = x.dtype if out_dtype is None else out_dtype

    num_cores = _num_tensorcores()
    if tile_b is None:
        tile_b = _choose_tile_b(B, num_cores)
    num_steps = _cdiv(B, tile_b)
    # v7x megacore: keep the grid length even so both TensorCores stay busy.
    if num_steps > 1 and num_cores > 1 and num_steps % 2 == 1:
        num_steps += 1
    B_pad = num_steps * tile_b

    # Only materialize a padded copy of x when padding is actually required,
    # and fold the bf16 cast into that same pass. Otherwise pass x untouched
    # (the kernel casts), avoiding a full extra HBM read+write over x.
    if B_pad != B or Din_p != Din:
        x_in = jnp.pad(x, ((0, B_pad - B), (0, Din_p - Din))).astype(compute_dtype)
    else:
        x_in = x

    itm = jnp.dtype(compute_dtype).itemsize
    x_itm = jnp.dtype(x_in.dtype).itemsize
    o_itm = jnp.dtype(out_dtype).itemsize

    weights_vmem = ((Din_p * Dh_p + Dh_p * Dh_p + Dh_p * Dout_p) * itm  # single-buffered
                    + (2 * Dh_p + Dout_p) * 4)
    tiles_vmem = 2 * tile_b * Din_p * x_itm + 2 * tile_b * Dout_p * o_itm  # double-buffered
    interm_vmem = 4 * tile_b * Dh_p * 4                                    # f32 h headroom
    est_vmem = weights_vmem + tiles_vmem + interm_vmem

    # Leave ~25% of physical VMEM for Mosaic internal scratch / semaphores
    # (critical on v7x: 64 MiB per TC; ~96 MiB ceiling on 128 MiB parts).
    vmem_ceiling = (_vmem_capacity_bytes() * 3) // 4
    vmem_limit = min(max(32 << 20, int(1.25 * est_vmem) + (4 << 20)), vmem_ceiling)
    # TODO(synk): when bf16 weights alone approach vmem_ceiling (very large hidden
    # dims), add a hidden-dim-tiled fallback (second "arbitrary" grid axis + f32
    # VMEM accumulator with pl.when init/finalize) instead of fully-resident W1-W3.

    flops = 2 * B_pad * (Din_p * Dh_p + Dh_p * Dh_p + Dh_p * Dout_p)
    transcendentals = 2 * B_pad * Dh_p
    bytes_accessed = (x_in.size * x_itm
                      + (w1p.size + w2p.size + w3p.size) * itm
                      + (b1p.size + b2p.size + b3p.size) * 4
                      + B_pad * Dout_p * o_itm)

    # Grid-invariant weights/biases: single buffer (halves their VMEM footprint).
    const_mode = pl.Buffered(1)

    out = pl.pallas_call(
        mlp_kernel,
        out_shape=jax.ShapeDtypeStruct((B_pad, Dout_p), out_dtype),
        grid_spec=pltpu.PrefetchScalarGridSpec(
            num_scalar_prefetch=0,
            grid=(num_steps,),
            in_specs=[
                pl.BlockSpec((tile_b, Din_p), lambda i: (i, 0)),  # x tile (pipelined)
                pl.BlockSpec((Din_p, Dh_p), lambda i: (0, 0), pipeline_mode=const_mode),   # W1
                pl.BlockSpec((1, Dh_p), lambda i: (0, 0), pipeline_mode=const_mode),       # b1
                pl.BlockSpec((Dh_p, Dh_p), lambda i: (0, 0), pipeline_mode=const_mode),    # W2
                pl.BlockSpec((1, Dh_p), lambda i: (0, 0), pipeline_mode=const_mode),       # b2
                pl.BlockSpec((Dh_p, Dout_p), lambda i: (0, 0), pipeline_mode=const_mode),  # W3
                pl.BlockSpec((1, Dout_p), lambda i: (0, 0), pipeline_mode=const_mode),     # b3
            ],
            out_specs=pl.BlockSpec((tile_b, Dout_p), lambda i: (i, 0)),
        ),
        compiler_params=pltpu.CompilerParams(
            dimension_semantics=("parallel",),
            vmem_limit_bytes=vmem_limit,
        ),
        cost_estimate=pl.CostEstimate(
            flops=flops,
            transcendentals=transcendentals,
            bytes_accessed=bytes_accessed,
        ),
    )(x_in, w1p, b1p, w2p, b2p, w3p, b3p)

    # Skip the slice entirely when it's a no-op (avoids an extra HBM copy).
    if B_pad == B and Dout_p == Dout:
        return out
    return out[:B, :Dout]


def mlp_pallas(x, w1, b1, w2, b2, w3, b3, *, tile_b=None,
               compute_dtype=jnp.bfloat16, out_dtype=None):
    """Convenience one-shot entry (prepares weights per call). For repeated
    invocations, call prepare_mlp_params once and use mlp_pallas_prepared."""
    params, meta = prepare_mlp_params(w1, b1, w2, b2, w3, b3, compute_dtype)
    return mlp_pallas_prepared(x, params, meta, tile_b=tile_b, out_dtype=out_dtype)


# ----------------------------- references -----------------------------------
def mlp_reference_f32(x, w1, b1, w2, b2, w3, b3):
    h = _gelu_exact(x @ w1 + b1)
    h = _gelu_exact(h @ w2 + b2)
    return h @ w3 + b3


def mlp_reference_bf16(x, w1, b1, w2, b2, w3, b3):
    # Same bf16-operand / f32-accumulate math the kernel performs.
    bf = jnp.bfloat16
    h = jnp.dot(x.astype(bf), w1.astype(bf), preferred_element_type=jnp.float32) + b1
    h = _gelu_exact(h)
    h = jnp.dot(h.astype(bf), w2.astype(bf), preferred_element_type=jnp.float32) + b2
    h = _gelu_exact(h)
    return jnp.dot(h.astype(bf), w3.astype(bf), preferred_element_type=jnp.float32) + b3


if __name__ == "__main__":
    key = jax.random.PRNGKey(0)
    # in_features=32, hidden_features=64, out_features=16; ragged batch=50 to
    # exercise the pad-and-slice path (single 56-row grid step after padding).
    B, Din, Dh, Dout = 50, 32, 64, 16

    keys = jax.random.split(key, 7)
    x = jax.random.normal(keys[0], (B, Din), dtype=jnp.float32)

    # Deterministic init (uniform in +-1/sqrt(fan_in), like PyTorch Linear).
    def init_linear(kw, kb, fan_in, fan_out):
        bound = 1.0 / jnp.sqrt(jnp.float32(fan_in))
        w = jax.random.uniform(kw, (fan_in, fan_out), jnp.float32, -bound, bound)
        b = jax.random.uniform(kb, (fan_out,), jnp.float32, -bound, bound)
        return w, b

    w1, b1 = init_linear(keys[1], keys[2], Din, Dh)
    w2, b2 = init_linear(keys[3], keys[4], Dh, Dh)
    w3, b3 = init_linear(keys[5], keys[6], Dh, Dout)

    # One-time weight preparation (lane-dense pad to 128 multiples + bf16 cast).
    params, meta = prepare_mlp_params(w1, b1, w2, b2, w3, b3)

    out = mlp_pallas_prepared(x, params, meta)
    out = jax.block_until_ready(out)
    assert out.shape == (B, Dout)

    # Tight check vs. a reference doing the same bf16-operand / f32-accum math.
    ref_bf16 = mlp_reference_bf16(x, w1, b1, w2, b2, w3, b3)
    assert jnp.allclose(out, ref_bf16, atol=2e-3, rtol=2e-3), "mismatch vs bf16 reference"

    # Looser check vs. the pure-f32 PyTorch-equivalent forward pass.
    ref_f32 = mlp_reference_f32(x, w1, b1, w2, b2, w3, b3)
    assert jnp.allclose(out, ref_f32, atol=5e-2, rtol=5e-2), "mismatch vs f32 reference"

    print("KERNEL_OK")
</pallas_src>

<mosaic_0001>
module attributes {stable_mosaic.version = 11 : i64} {
  func.func @mlp_kernel(%arg0: i32, %arg1: memref<56x128xbf16, #tpu.memory_space<vmem>>, %arg2: memref<128x128xbf16, #tpu.memory_space<vmem>>, %arg3: memref<1x128xf32, #tpu.memory_space<vmem>>, %arg4: memref<128x128xbf16, #tpu.memory_space<vmem>>, %arg5: memref<1x128xf32, #tpu.memory_space<vmem>>, %arg6: memref<128x128xbf16, #tpu.memory_space<vmem>>, %arg7: memref<1x128xf32, #tpu.memory_space<vmem>>, %arg8: memref<56x128xf32, #tpu.memory_space<vmem>>) attributes {dimension_semantics = [#tpu.dimension_semantics<parallel>], iteration_bounds = array<i64: 1>, scalar_prefetch = 0 : i64, scratch_operands = 0 : i64, tpu.core_type = #tpu.core_type<tc>, window_params = [{transform_indices = @transform_0, window_bounds = array<i64: 56, 128>}, {pipeline_mode = #tpu.pipeline_mode<synchronous>, transform_indices = @transform_1, window_bounds = array<i64: 128, 128>}, {pipeline_mode = #tpu.pipeline_mode<synchronous>, transform_indices = @transform_2, window_bounds = array<i64: 1, 128>}, {pipeline_mode = #tpu.pipeline_mode<synchronous>, transform_indices = @transform_3, window_bounds = array<i64: 128, 128>}, {pipeline_mode = #tpu.pipeline_mode<synchronous>, transform_indices = @transform_4, window_bounds = array<i64: 1, 128>}, {pipeline_mode = #tpu.pipeline_mode<synchronous>, transform_indices = @transform_5, window_bounds = array<i64: 128, 128>}, {pipeline_mode = #tpu.pipeline_mode<synchronous>, transform_indices = @transform_6, window_bounds = array<i64: 1, 128>}, {transform_indices = @transform_7, window_bounds = array<i64: 56, 128>}]} {
    %c0 = arith.constant 0 : index
    %c0_0 = arith.constant 0 : index
    %0 = vector.load %arg1[%c0, %c0_0] : memref<56x128xbf16, #tpu.memory_space<vmem>>, vector<56x128xbf16>
    %c0_1 = arith.constant 0 : index
    %c0_2 = arith.constant 0 : index
    %1 = vector.load %arg2[%c0_1, %c0_2] : memref<128x128xbf16, #tpu.memory_space<vmem>>, vector<128x128xbf16>
    %cst = arith.constant dense<0.000000e+00> : vector<56x128xf32>
    %2 = tpu.matmul %0, %1, %cst {dimension_numbers = #tpu.dot_dimension_numbers<[1], [0], [0], [1], [0, 0, 1, 1], [], []>} : vector<56x128xbf16>, vector<128x128xbf16>, vector<56x128xf32> -> vector<56x128xf32>
    %c0_3 = arith.constant 0 : index
    %c0_4 = arith.constant 0 : index
    %3 = vector.load %arg3[%c0_3, %c0_4] : memref<1x128xf32, #tpu.memory_space<vmem>>, vector<1x128xf32>
    %4 = vector.broadcast %3 : vector<1x128xf32> to vector<56x128xf32>
    %5 = arith.addf %2, %4 : vector<56x128xf32>
    %cst_5 = arith.constant 5.000000e-01 : f32
    %6 = vector.broadcast %cst_5 : f32 to vector<56x128xf32>
    %7 = arith.mulf %6, %5 : vector<56x128xf32>
    %cst_6 = arith.constant 0.707106769 : f32
    %8 = vector.broadcast %cst_6 : f32 to vector<56x128xf32>
    %9 = arith.mulf %5, %8 : vector<56x128xf32>
    %10 = math.erf %9 : vector<56x128xf32>
    %cst_7 = arith.constant 1.000000e+00 : f32
    %11 = vector.broadcast %cst_7 : f32 to vector<56x128xf32>
    %12 = arith.addf %11, %10 : vector<56x128xf32>
    %13 = arith.mulf %7, %12 : vector<56x128xf32>
    %14 = arith.truncf %13 : vector<56x128xf32> to vector<56x128xbf16>
    %c0_8 = arith.constant 0 : index
    %c0_9 = arith.constant 0 : index
    %15 = vector.load %arg4[%c0_8, %c0_9] : memref<128x128xbf16, #tpu.memory_space<vmem>>, vector<128x128xbf16>
    %cst_10 = arith.constant dense<0.000000e+00> : vector<56x128xf32>
    %16 = tpu.matmul %14, %15, %cst_10 {dimension_numbers = #tpu.dot_dimension_numbers<[1], [0], [0], [1], [0, 0, 1, 1], [], []>} : vector<56x128xbf16>, vector<128x128xbf16>, vector<56x128xf32> -> vector<56x128xf32>
    %c0_11 = arith.constant 0 : index
    %c0_12 = arith.constant 0 : index
    %17 = vector.load %arg5[%c0_11, %c0_12] : memref<1x128xf32, #tpu.memory_space<vmem>>, vector<1x128xf32>
    %18 = vector.broadcast %17 : vector<1x128xf32> to vector<56x128xf32>
    %19 = arith.addf %16, %18 : vector<56x128xf32>
    %cst_13 = arith.constant 5.000000e-01 : f32
    %20 = vector.broadcast %cst_13 : f32 to vector<56x128xf32>
    %21 = arith.mulf %20, %19 : vector<56x128xf32>
    %cst_14 = arith.constant 0.707106769 : f32
    %22 = vector.broadcast %cst_14 : f32 to vector<56x128xf32>
    %23 = arith.mulf %19, %22 : vector<56x128xf32>
    %24 = math.erf %23 : vector<56x128xf32>
    %cst_15 = arith.constant 1.000000e+00 : f32
    %25 = vector.broadcast %cst_15 : f32 to vector<56x128xf32>
    %26 = arith.addf %25, %24 : vector<56x128xf32>
    %27 = arith.mulf %21, %26 : vector<56x128xf32>
    %28 = arith.truncf %27 : vector<56x128xf32> to vector<56x128xbf16>
    %c0_16 = arith.constant 0 : index
    %c0_17 = arith.constant 0 : index
    %29 = vector.load %arg6[%c0_16, %c0_17] : memref<128x128xbf16, #tpu.memory_space<vmem>>, vector<128x128xbf16>
    %cst_18 = arith.constant dense<0.000000e+00> : vector<56x128xf32>
    %30 = tpu.matmul %28, %29, %cst_18 {dimension_numbers = #tpu.dot_dimension_numbers<[1], [0], [0], [1], [0, 0, 1, 1], [], []>} : vector<56x128xbf16>, vector<128x128xbf16>, vector<56x128xf32> -> vector<56x128xf32>
    %c0_19 = arith.constant 0 : index
    %c0_20 = arith.constant 0 : index
    %31 = vector.load %arg7[%c0_19, %c0_20] : memref<1x128xf32, #tpu.memory_space<vmem>>, vector<1x128xf32>
    %32 = vector.broadcast %31 : vector<1x128xf32> to vector<56x128xf32>
    %33 = arith.addf %30, %32 : vector<56x128xf32>
    %c0_21 = arith.constant 0 : index
    %c0_22 = arith.constant 0 : index
    %34 = vector.load %arg8[%c0_21, %c0_22] : memref<56x128xf32, #tpu.memory_space<vmem>>, vector<56x128xf32>
    tpu.vector_store %arg8[%c0_21, %c0_22], %33 {strides = array<i32>} : memref<56x128xf32, #tpu.memory_space<vmem>>, vector<56x128xf32>,
    return
  }
  func.func @transform_0(%arg0: i32) -> (i32, i32) {
    %c0_i32 = arith.constant 0 : i32
    %c0_i32_0 = arith.constant 0 : i32
    return %arg0, %c0_i32 : i32, i32
  }
  func.func @transform_1(%arg0: i32) -> (i32, i32) {
    %c0_i32 = arith.constant 0 : i32
    %c0_i32_0 = arith.constant 0 : i32
    %c0_i32_1 = arith.constant 0 : i32
    return %c0_i32, %c0_i32_0 : i32, i32
  }
  func.func @transform_2(%arg0: i32) -> (i32, i32) {
    %c0_i32 = arith.constant 0 : i32
    %c0_i32_0 = arith.constant 0 : i32
    %c0_i32_1 = arith.constant 0 : i32
    return %c0_i32, %c0_i32_0 : i32, i32
  }
  func.func @transform_3(%arg0: i32) -> (i32, i32) {
    %c0_i32 = arith.constant 0 : i32
    %c0_i32_0 = arith.constant 0 : i32
    %c0_i32_1 = arith.constant 0 : i32
    return %c0_i32, %c0_i32_0 : i32, i32
  }
  func.func @transform_4(%arg0: i32) -> (i32, i32) {
    %c0_i32 = arith.constant 0 : i32
    %c0_i32_0 = arith.constant 0 : i32
    %c0_i32_1 = arith.constant 0 : i32
    return %c0_i32, %c0_i32_0 : i32, i32
  }
  func.func @transform_5(%arg0: i32) -> (i32, i32) {
    %c0_i32 = arith.constant 0 : i32
    %c0_i32_0 = arith.constant 0 : i32
    %c0_i32_1 = arith.constant 0 : i32
    return %c0_i32, %c0_i32_0 : i32, i32
  }
  func.func @transform_6(%arg0: i32) -> (i32, i32) {
    %c0_i32 = arith.constant 0 : i32
    %c0_i32_0 = arith.constant 0 : i32
    %c0_i32_1 = arith.constant 0 : i32
    return %c0_i32, %c0_i32_0 : i32, i32
  }
  func.func @transform_7(%arg0: i32) -> (i32, i32) {
    %c0_i32 = arith.constant 0 : i32
    %c0_i32_0 = arith.constant 0 : i32
    return %arg0, %c0_i32 : i32, i32
  }
}

</mosaic_0001>

<bundles_post_ra>
// kernel: tpu_custom_call.1
= control target key start
LH: loop header
LB: loop body
LE: loop exit
PB: predicated region body
PF: predicated region fallthrough
CT: control target
= control target key end

     0   :  { %12 = vsyncpa [#allocation3], 0  ;;  %s1903_s0 = inlined_call_operand.hbm [shape: bf16[56,128], index: 0, kind: input, shape index: {}]   ;;  %s1904_s1 = inlined_call_operand.hbm [shape: bf16[128,128], index: 1, kind: input, shape index: {}]   ;;  %s1905_s2 = inlined_call_operand.vmem [shape: f32[1,128], index: 2, kind: input, shape index: {}]   ;;  %s1906_s3 = inlined_call_operand.hbm [shape: bf16[128,128], index: 3, kind: input, shape index: {}]   ;;  %s1907_s4 = inlined_call_operand.vmem [shape: f32[1,128], index: 4, kind: input, shape index: {}]   ;;  %s1908_s5 = inlined_call_operand.hbm [shape: bf16[128,128], index: 5, kind: input, shape index: {}]   ;;  %s1909_s6 = inlined_call_operand.vmem [shape: f32[1,128], index: 6, kind: input, shape index: {}]   ;;  %s1910_s7 = inlined_call_operand.hbm [shape: f32[56,128], index: 7, kind: output, shape index: {}]  }
   0x1   :  { %13 = vsyncpa [#allocation6], 0 }
   0x2   :  { %14 = vsyncpa [#allocation9], 0 }
   0x3   :  { %15 = vsyncpa [#allocation4], 0  ;;  %s33_s26 = sshll.u32 %s1904_s1, 4  ;;  %s1384_s27 = smov [#allocation5]   ;;  %s34_s26 = int_to_ptr.hbm [resolvable:$true] %s33_s26 }
   0x4   :  { %s35_s28 = sshll.u32 %s1384_s27, 4  ;;  %s20_s8 = sshll.u32 %s1903_s0, 4  ;;  %s36_s28 = int_to_ptr.vmem [resolvable:$true] %s35_s28  ;;  %s21_s8 = int_to_ptr.hbm [resolvable:$true] %s20_s8 }
   0x5   :  { %s1385_s9 = smov 64   ;;  %s1386_s10 = smov 4  }
   0x6   :  { %41 = dma.hbm_to_vmem [thread:$0]  %s34_s26, 1024, %s36_s28, [#allocation6], %s1385_s9, %s1385_s9, %s1386_s10  }
   0x7   :  { %s1387_s11 = smov [#allocation2]   ;;  %s48_s15 = sshll.u32 %s1906_s3, 4  ;;  %s49_s15 = int_to_ptr.hbm [resolvable:$true] %s48_s15 }
   0x8   :  { %s22_s12 = sshll.u32 %s1387_s11, 4  ;;  %s63_s17 = sshll.u32 %s1908_s5, 4  ;;  %s23_s12 = int_to_ptr.vmem [resolvable:$true] %s22_s12  ;;  %s64_s17 = int_to_ptr.hbm [resolvable:$true] %s63_s17 }
   0x9   :  { %28 = dma.hbm_to_vmem [thread:$0]  %s21_s8, 448, %s23_s12, [#allocation3], %s1385_s9, %s1385_s9, %s1386_s10  }
   0xa   :  { %s1388_s18 = smov [#allocation7]   ;;  %s1389_s0 = smov [#allocation8]  }
   0xb   :  { %s50_s19 = sshll.u32 %s1388_s18, 4  ;;  %s65_s20 = sshll.u32 %s1389_s0, 4  ;;  %s51_s19 = int_to_ptr.vmem [resolvable:$true] %s50_s19  ;;  %s66_s20 = int_to_ptr.vmem [resolvable:$true] %s65_s20 }
   0xc   :  { %56 = dma.hbm_to_vmem [thread:$0]  %s49_s15, 1024, %s51_s19, [#allocation6], %s1385_s9, %s1385_s9, %s1386_s10  }
   0xd   :  { %71 = dma.hbm_to_vmem [thread:$0]  %s64_s17, 1024, %s66_s20, [#allocation9], %s1385_s9, %s1385_s9, %s1386_s10  }
   0xe   :  { %1376 = dma.done.wait [#allocation3], 448  }
   0xf   :  { %1377 = vsyncadd [#allocation3], 4294966848 }
  0x10   :  { %1378 = dma.done.wait [#allocation6], 2048  }
  0x11   :  { %1379 = vsyncadd [#allocation6], 4294965248 }
  0x12   :  { %1380 = dma.done.wait [#allocation9], 1024  }
  0x13   :  { %1381 = vsyncadd [#allocation9], 4294966272  ;;  %v1191_v0 = vld [vmem:[#allocation5 + $0x38] sm:$0xff]  ;;  %v1190_v1 = vld [vmem:[#allocation5 + $0x30] sm:$0xff]  ;;  %s1390_s23 = smov [#allocation10]   ;;  %s1044_s26 = sshll.u32 %s1910_s7, 4  ;;  %s1045_s26 = int_to_ptr.hbm [resolvable:$true] %s1044_s26 }
  0x14   :  { %187 = vmatpush.bf16.msra.mxu0 %v1191_v0  ;;  %1208 = vmatpush.bf16.msra.mxu3 %v1191_v0  ;;  %v1189_v2 = vld [vmem:[#allocation5 + $0x28] sm:$0xff]  ;;  %v1188_v3 = vld [vmem:[#allocation5 + $0x20] sm:$0xff]  ;;  %v1187_v4 = vld [vmem:[#allocation5 + $0x18] sm:$0xff]  ;;  %s1391_s27 = smov 128   ;;  %s1392_s28 = smov 8  }
  0x15   :  { %v1186_v5 = vld [vmem:[#allocation5 + $0x10] sm:$0xff]  ;;  %v1185_v6 = vld [vmem:[#allocation5 + $0x8] sm:$0xff]  ;;  %v1184_v7 = vld [vmem:[#allocation5] sm:$0xff] }
  0x16   :  { %v1181_v8 = vld [vmem:[#allocation2] sm:$0xff]  ;;  %v1182_v9 = vld [vmem:[#allocation2 + $0x8] sm:$0xff]  ;;  %v1183_v10 = vld [vmem:[#allocation2 + $0x10] sm:$0xff] }
  0x17   :  { %v96_v11 = vld [vmem:[#allocation2 + $0x18] sm:$0xf]  ;;  %v1448_v14 = vld [vmem:[%s1905_s2] ss:$0 sm:$0xff]  ;;  %v1198_v19 = vld [vmem:[#allocation7 + $0x30] sm:$0xff] }
  0x18   :  { %188 = vmatpush.bf16.msra.mxu0 %v1190_v1  ;;  %1209 = vmatpush.bf16.msra.mxu3 %v1190_v1  ;;  %v130_v12 = vunpack.c.l.b16 %v96_v11  ;;  %v1199_v16 = vld [vmem:[#allocation7 + $0x38] sm:$0xff]  ;;  %v1197_v25 = vld [vmem:[#allocation7 + $0x28] sm:$0xff]  ;;  %v1196_v32 = vld [vmem:[#allocation7 + $0x20] sm:$0xff] }
  0x19   :  { %595 = vmatpush.bf16.msra.mxu1 %v1199_v16  ;;  %v1195_v42 = vld [vmem:[#allocation7 + $0x18] sm:$0xff]  ;;  %v1194_v54 = vld [vmem:[#allocation7 + $0x10] sm:$0xff] }
  0x1a   :  { %v134_v13 = vpack.c.b16 %v130_v12, %v130_v12 }
  0x1c   :  { %189 = vmatpush.bf16.msra.mxu0 %v1189_v2  ;;  %1210 = vmatpush.bf16.msra.mxu3 %v1189_v2 }
  0x1d   :  { %596 = vmatpush.bf16.msra.mxu1 %v1198_v19 }
  0x20   :  { %190 = vmatpush.bf16.msra.mxu0 %v1188_v3  ;;  %1211 = vmatpush.bf16.msra.mxu3 %v1188_v3  ;;  %v1193_v3 = vld [vmem:[#allocation7 + $0x8] sm:$0xff] }
  0x21   :  { %597 = vmatpush.bf16.msra.mxu1 %v1197_v25 }
  0x24   :  { %191 = vmatpush.bf16.msra.mxu0 %v1187_v4  ;;  %1212 = vmatpush.bf16.msra.mxu3 %v1187_v4 }
  0x25   :  { %598 = vmatpush.bf16.msra.mxu1 %v1196_v32 }
  0x28   :  { %192 = vmatpush.bf16.msra.mxu0 %v1186_v5  ;;  %1213 = vmatpush.bf16.msra.mxu3 %v1186_v5 }
  0x29   :  { %599 = vmatpush.bf16.msra.mxu1 %v1195_v42 }
  0x2c   :  { %193 = vmatpush.bf16.msra.mxu0 %v1185_v6  ;;  %1214 = vmatpush.bf16.msra.mxu3 %v1185_v6 }
  0x2d   :  { %600 = vmatpush.bf16.msra.mxu1 %v1194_v54 }
  0x30   :  { %194 = vmatpush.bf16.msra.mxu0 %v1184_v7  ;;  %1215 = vmatpush.bf16.msra.mxu3 %v1184_v7 }
  0x31   :  { %601 = vmatpush.bf16.msra.mxu1 %v1193_v3 }
  0x33   :  { %195 = vmatmul.bf16.vlgmr.msra.gmra.mxu0 %v1181_v8  ;;  %200 = vmatmul.bf16.vlgmr.msra.gmra.mxu3 %v1182_v9 }
  0x43   :  { %205 = vmatmul.bf16.gmra.mxu3 %v1183_v10 }
  0x53   :  { %210 = vmatmul.bf16.gmra.mxu3 %v134_v13  ;;  %v1192_v13 = vld [vmem:[#allocation7] sm:$0xff] }
  0x54   :  { %602 = vmatpush.bf16.msra.mxu1 %v1192_v13 }
  0xb0   :  { %v196_v15 = vpop.f32.mrf.mxu0 }
  0xb1   :  { %v1451_v17 = vadd.f32 %v1448_v14, %v196_v15 }
  0xb3   :  { %v1454_v18 = vmul.f32 0.70710677, %v1451_v17 }
  0xb5   :  { %v229_v20 = vmul.f32 %v1454_v18, %v1454_v18 }
  0xb6   :  { %v201_v21 = vpop.f32.mrf.mxu3 }
  0xb7   :  { %v1458_v22 = vmin.f32 %v229_v20, 16.0  ;;  %v1461_v23 = vadd.f32 %v1448_v14, %v201_v21 }
  0xb8   :  { %v198_v24 = vpop.f32.mrf.mxu0 }
  0xb9   :  { %v231_v26 = vmul.f32 2.1237322e-06, %v1458_v22  ;;  %v1465_v27 = vmul.f32 0.70710677, %v1461_v23  ;;  %v1468_v28 = vadd.f32 %v1448_v14, %v198_v24  ;;  %v242_v29 = vmul.f32 3.8918573e-05, %v1458_v22 }
  0xbb   :  { %v309_v30 = vmul.f32 %v1465_v27, %v1465_v27  ;;  %v1474_v31 = vmul.f32 0.70710677, %v1468_v28  ;;  %v243_v33 = vadd.f32 0.001143296, %v242_v29  ;;  %v232_v34 = vadd.f32 0.00028619796, %v231_v26 }
  0xbd   :  { %v1476_v35 = vmin.f32 %v309_v30, 16.0  ;;  %v269_v36 = vmul.f32 %v1474_v31, %v1474_v31  ;;  %v244_v38 = vmul.f32 %v243_v33, %v1458_v22  ;;  %v233_v45 = vmul.f32 %v232_v34, %v1458_v22 }
  0xbe   :  { %v203_v37 = vpop.f32.mrf.mxu3 }
  0xbf   :  { %v311_v39 = vmul.f32 2.1237322e-06, %v1476_v35  ;;  %v1482_v40 = vmin.f32 %v269_v36, 16.0  ;;  %v1485_v41 = vadd.f32 %v1448_v14, %v203_v37  ;;  %v245_v43 = vadd.f32 0.014752088, %v244_v38 }
  0xc0   :  { %v322_v44 = vmul.f32 3.8918573e-05, %v1476_v35  ;;  %v234_v59 = vadd.f32 0.0036580483, %v233_v45 }
  0xc1   :  { %v271_v46 = vmul.f32 2.1237322e-06, %v1482_v40  ;;  %v1491_v47 = vmul.f32 0.70710677, %v1485_v41  ;;  %v246_v48 = vmul.f32 %v245_v43, %v1458_v22  ;;  %v282_v49 = vmul.f32 3.8918573e-05, %v1482_v40 }
  0xc2   :  { %v323_v50 = vadd.f32 0.001143296, %v322_v44  ;;  %v312_v51 = vadd.f32 0.00028619796, %v311_v39  ;;  %v235_v7 = vmul.f32 %v234_v59, %v1458_v22 }
  0xc3   :  { %v272_v52 = vadd.f32 0.00028619796, %v271_v46  ;;  %v349_v53 = vmul.f32 %v1491_v47, %v1491_v47  ;;  %v247_v55 = vadd.f32 0.112945676, %v246_v48  ;;  %v283_v56 = vadd.f32 0.001143296, %v282_v49 }
  0xc4   :  { %v324_v57 = vmul.f32 %v323_v50, %v1476_v35  ;;  %v313_v0 = vmul.f32 %v312_v51, %v1476_v35  ;;  %v236_v21 = vadd.f32 0.05243302, %v235_v7 }
  0xc5   :  { %v273_v58 = vmul.f32 %v272_v52, %v1482_v40  ;;  %v248_v61 = vmul.f32 %v247_v55, %v1458_v22  ;;  %v284_v62 = vmul.f32 %v283_v56, %v1482_v40  ;;  %v1502_v1 = vmin.f32 %v349_v53, 16.0 }
  0xc6   :  { %v206_v60 = vpop.f32.mrf.mxu3  ;;  %v325_v63 = vadd.f32 0.014752088, %v324_v57  ;;  %v314_v10 = vadd.f32 0.0036580483, %v313_v0  ;;  %v237_v37 = vmul.f32 %v236_v21, %v1458_v22 }
  0xc7   :  { %v274_v2 = vadd.f32 0.0036580483, %v273_v58  ;;  %v249_v4 = vadd.f32 0.4994258, %v248_v61  ;;  %v1506_v6 = vadd.f32 %v1448_v14, %v206_v60  ;;  %v285_v9 = vadd.f32 0.014752088, %v284_v62 }
  0xc8   :  { %v326_v5 = vmul.f32 %v325_v63, %v1476_v35  ;;  %v351_v11 = vmul.f32 2.1237322e-06, %v1502_v1  ;;  %v315_v25 = vmul.f32 %v314_v10, %v1476_v35  ;;  %v238_v50 = vadd.f32 0.18741608, %v237_v37 }
  0xc9   :  { %v250_v8 = vmul.f32 %v249_v4, %v1458_v22  ;;  %v275_v12 = vmul.f32 %v274_v2, %v1482_v40  ;;  %v286_v16 = vmul.f32 %v285_v9, %v1482_v40  ;;  %v1516_v20 = vmul.f32 0.70710677, %v1506_v6 }
  0xca   :  { %v327_v19 = vadd.f32 0.112945676, %v326_v5  ;;  %v352_v26 = vadd.f32 0.00028619796, %v351_v11  ;;  %v316_v38 = vadd.f32 0.05243302, %v315_v25  ;;  %v239_v0 = vmul.f32 %v238_v50, %v1458_v22 }
  0xcb   :  { %v1512_v15 = vadd.f32 1.0, %v250_v8  ;;  %v276_v30 = vadd.f32 0.05243302, %v275_v12  ;;  %v287_v32 = vadd.f32 0.112945676, %v286_v16  ;;  %v389_v34 = vmul.f32 %v1516_v20, %v1516_v20 }
  0xcc   :  { %v328_v33 = vmul.f32 %v327_v19, %v1476_v35  ;;  %v353_v39 = vmul.f32 %v352_v26, %v1502_v1  ;;  %v317_v54 = vmul.f32 %v316_v38, %v1476_v35  ;;  %v362_v3 = vmul.f32 3.8918573e-05, %v1502_v1 }
  0xcd   :  { %1228 = vrcp.f32 %v1512_v15  ;;  %v288_v42 = vmul.f32 %v287_v32, %v1482_v40  ;;  %v277_v44 = vmul.f32 %v276_v30, %v1482_v40  ;;  %v1533_v46 = vmin.f32 %v389_v34, 16.0 }
  0xce   :  { %v208_v24 = vpop.f32.mrf.mxu3  ;;  %v329_v45 = vadd.f32 0.4994258, %v328_v33  ;;  %v354_v55 = vadd.f32 0.0036580483, %v353_v39  ;;  %v318_v4 = vadd.f32 0.18741608, %v317_v54  ;;  %vm257_vm1 = vweird.f32 %v1512_v15 }
  0xcf   :  { %v1521_v29 = vadd.f32 %v1448_v14, %v208_v24  ;;  %v289_v52 = vadd.f32 0.4994258, %v288_v42  ;;  %v278_v57 = vadd.f32 0.18741608, %v277_v44  ;;  %v391_v61 = vmul.f32 2.1237322e-06, %v1533_v46 }
  0xd0   :  { %v330_v53 = vmul.f32 %v329_v45, %v1476_v35  ;;  %v355_v5 = vmul.f32 %v354_v55, %v1502_v1  ;;  %v240_v10 = vadd.f32 1.1283791, %v239_v0  ;;  %v263_v12 = vand.u32 2147483648, %v1512_v15 }
  0xd1   :  { %v1527_v36 = vmul.f32 0.70710677, %v1521_v29  ;;  %v290_v59 = vmul.f32 %v289_v52, %v1482_v40  ;;  %v392_v8 = vadd.f32 0.00028619796, %v391_v61  ;;  %v363_v13 = vadd.f32 0.001143296, %v362_v3 }
  0xd2   :  { %v1544_v60 = vadd.f32 1.0, %v330_v53  ;;  %v319_v16 = vmul.f32 %v318_v4, %v1476_v35  ;;  %v356_v19 = vadd.f32 0.05243302, %v355_v5  ;;  %v1574_v30 = vmul.f32 0.5, %v1451_v17 }
  0xd3   :  { %v1229_v43 = vpop.eup %1228  ;;  %v429_v48 = vmul.f32 %v1527_v36, %v1527_v36  ;;  %v1550_v2 = vadd.f32 1.0, %v290_v59  ;;  %v393_v35 = vmul.f32 %v392_v8, %v1533_v46  ;;  %v241_v34 = vmul.f32 %v240_v10, %v1454_v18 }
  0xd4   :  { %v253_v49 = vmul.f32 %v1229_v43, %v1512_v15  ;;  %1230 = vrcp.f32 %v1544_v60  ;;  %vm258_vm0 = vweird.f32 %v1229_v43  ;;  %v1581_v37 = vmul.f32 0.5, %v1468_v28 }
  0xd5   :  { %v1547_v62 = vmin.f32 %v429_v48, 16.0  ;;  %1232 = vrcp.f32 %v1550_v2  ;;  %vm1567_vm2 = vmor %vm257_vm1, %vm258_vm0  ;;  %v264_v38 = vor.u32 1.1754944e-38, %v263_v12  ;;  %v364_v39 = vmul.f32 %v363_v13, %v1502_v1 }
  0xd6   :  { %v211_v51 = vpop.f32.mrf.mxu3  ;;  %v254_v56 = vsub.f32 1.0, %v253_v49  ;;  %v1584_v42 = vadd.f32 1.1283791, %v319_v16  ;;  %v357_v17 = vmul.f32 %v356_v19, %v1502_v1  ;;  %v394_v18 = vadd.f32 0.0036580483, %v393_v35 }
  0xd7   :  { %v1541_v58 = vadd.f32 %v1448_v14, %v211_v51  ;;  %v279_v14 = vmul.f32 %v278_v57, %v1482_v40  ;;  %v431_v9 = vmul.f32 2.1237322e-06, %v1547_v62  ;;  %v261_v40 = vand.u32 2147483647, %v1512_v15 }
  0xd8   :  { %v255_v63 = vmul.f32 %v1229_v43, %v254_v56  ;;  %v365_v49 = vadd.f32 0.014752088, %v364_v39  ;;  %v301_v52 = vand.u32 2147483647, %v1550_v2  ;;  %v303_v53 = vand.u32 2147483648, %v1550_v2 }
  0xd9   :  { %v1557_v7 = vmul.f32 0.70710677, %v1541_v58  ;;  %v280_v21 = vadd.f32 1.1283791, %v279_v14  ;;  %v432_v32 = vadd.f32 0.00028619796, %v431_v9  ;;  %vm297_vm5 = vweird.f32 %v1550_v2 }
  0xda   :  { %v256_v22 = vadd.f32 %v1229_v43, %v255_v63  ;;  %v1571_v26 = vpop.eup %1230  ;;  %vm262_vm3 = vcmp.eq.f32.partialorder %v261_v40, 8.507059e+37  ;;  %v366_v54 = vmul.f32 %v365_v49, %v1502_v1  ;;  %v402_v55 = vmul.f32 3.8918573e-05, %v1533_v46 }
  0xdb   :  { %v469_v24 = vmul.f32 %v1557_v7, %v1557_v7  ;;  %v1233_v15 = vpop.eup %1232  ;;  %v281_v45 = vmul.f32 %v280_v21, %v1474_v31  ;;  %v433_v28 = vmul.f32 %v432_v32, %v1547_v62  ;;  %v333_v51 = vmul.f32 %v1571_v26, %v1544_v60 }
  0xdc   :  { %v260_v33 = vsel %vm1567_vm2, %v1229_v43, %v256_v22  ;;  %v293_v44 = vmul.f32 %v1233_v15, %v1550_v2  ;;  %vm298_vm4 = vweird.f32 %v1233_v15  ;;  %v442_v57 = vmul.f32 3.8918573e-05, %v1547_v62 }
  0xdd   :  { %v1589_v48 = vmin.f32 %v469_v24, 16.0  ;;  %v265_v43 = vsel %vm262_vm3, %v264_v38, %v260_v33  ;;  %v367_v59 = vadd.f32 0.112945676, %v366_v54  ;;  %v403_v61 = vadd.f32 0.001143296, %v402_v55  ;;  %vm299_vm6 = vmor %vm297_vm5, %vm298_vm4 }
  0xde   :  { %v213_v11 = vpop.f32.mrf.mxu3  ;;  %v294_v50 = vsub.f32 1.0, %v293_v44  ;;  %v266_v31 = vmul.f32 %v265_v43, %v241_v34  ;;  %v434_v0 = vadd.f32 0.0036580483, %v433_v28  ;;  %v334_v4 = vsub.f32 1.0, %v333_v51 }
  0xdf   :  { %v482_v63 = vmul.f32 3.8918573e-05, %v1589_v48  ;;  %v443_v5 = vadd.f32 0.001143296, %v442_v57  ;;  %v304_v14 = vor.u32 1.1754944e-38, %v303_v53  ;;  %v368_v8 = vmul.f32 %v367_v59, %v1502_v1 }
  0xe0   :  { %v295_v56 = vmul.f32 %v1233_v15, %v294_v50  ;;  %v404_v9 = vmul.f32 %v403_v61, %v1533_v46  ;;  %v358_v10 = vadd.f32 0.18741608, %v357_v17  ;;  %v1103_v11 = vclamps-f32 %v266_v31, 1.0 }
  0xe1   :  { %v483_v22 = vadd.f32 0.001143296, %v482_v63  ;;  %vm302_vm7 = vcmp.eq.f32.partialorder %v301_v52, 8.507059e+37  ;;  %v471_v2 = vmul.f32 2.1237322e-06, %v1589_v48  ;;  %v335_v21 = vmul.f32 %v1571_v26, %v334_v4 }
  0xe2   :  { %v296_v3 = vadd.f32 %v1233_v15, %v295_v56  ;;  %v369_v16 = vadd.f32 0.4994258, %v368_v8  ;;  %v405_v19 = vadd.f32 0.014752088, %v404_v9  ;;  %v444_v24 = vmul.f32 %v443_v5, %v1547_v62 }
  0xe3   :  { %v484_v25 = vmul.f32 %v483_v22, %v1589_v48  ;;  %v395_v35 = vmul.f32 %v394_v18, %v1533_v46  ;;  %v435_v32 = vmul.f32 %v434_v0, %v1547_v62  ;;  %v509_v38 = vadd.f32 1.0, %v1103_v11 }
  0xe4   :  { %v300_v12 = vsel %vm299_vm6, %v1233_v15, %v296_v3  ;;  %v370_v33 = vmul.f32 %v369_v16, %v1502_v1  ;;  %v406_v15 = vmul.f32 %v405_v19, %v1533_v46  ;;  %v445_v39 = vadd.f32 0.014752088, %v444_v24 }
  0xe5   :  { %v305_v13 = vsel %vm302_vm7, %v304_v14, %v300_v12  ;;  %v485_v17 = vadd.f32 0.014752088, %v484_v25  ;;  %v472_v44 = vadd.f32 0.00028619796, %v471_v2  ;;  %vm338_vm8 = vweird.f32 %v1571_v26 }
  0xe6   :  { %v306_v40 = vmul.f32 %v305_v13, %v281_v45  ;;  %v1612_v45 = vadd.f32 1.0, %v370_v33  ;;  %v407_v43 = vadd.f32 0.112945676, %v406_v15  ;;  %v336_v28 = vadd.f32 %v1571_v26, %v335_v21 }
  0xe7   :  { %v446_v18 = vmul.f32 %v445_v39, %v1547_v62  ;;  %v486_v50 = vmul.f32 %v485_v17, %v1589_v48  ;;  %v396_v51 = vadd.f32 0.05243302, %v395_v35  ;;  %vm337_vm9 = vweird.f32 %v1544_v60 }
  0xe8   :  { %v1104_v34 = vclamps-f32 %v306_v40, 1.0  ;;  %v343_v52 = vand.u32 2147483648, %v1544_v60  ;;  %1234 = vrcp.f32 %v1612_v45  ;;  %v516_v53 = vmul.f32 %v509_v38, %v1574_v30  ;;  %vm1626_vm10 = vmor %vm337_vm9, %vm338_vm8 }
  0xe9   :  { %v341_v55 = vand.u32 2147483647, %v1544_v60  ;;  %v408_v31 = vmul.f32 %v407_v43, %v1533_v46  ;;  %v436_v56 = vadd.f32 0.05243302, %v435_v32  ;;  %v447_v59 = vadd.f32 0.112945676, %v446_v18 }
  0xea   :  { %v510_v49 = vadd.f32 1.0, %v1104_v34  ;;  %v487_v61 = vadd.f32 0.112945676, %v486_v50  ;;  %v473_v63 = vmul.f32 %v472_v44, %v1589_v48  ;;  %v340_v30 = vsel %vm1626_vm10, %v1571_v26, %v336_v28 }
  0xeb   :  { %v359_v60 = vmul.f32 %v358_v10, %v1502_v1  ;;  %v344_v3 = vor.u32 1.1754944e-38, %v343_v52  ;;  %v448_v4 = vmul.f32 %v447_v59, %v1547_v62  ;;  %v397_v14 = vmul.f32 %v396_v51, %v1533_v46 }
  0xec   :  { %v517_v54 = vmul.f32 %v510_v49, %v1581_v37  ;;  %v409_v37 = vadd.f32 0.4994258, %v408_v31  ;;  %v488_v5 = vmul.f32 %v487_v61, %v1589_v48  ;;  %vm342_vm11 = vcmp.eq.f32.partialorder %v341_v55, 8.507059e+37 }
  0xed   :  { %v437_v22 = vmul.f32 %v436_v56, %v1547_v62  ;;  %v345_v11 = vsel %vm342_vm11, %v344_v3, %v340_v30  ;;  %v449_v12 = vadd.f32 0.4994258, %v448_v4  ;;  %v321_v1 = vmul.f32 %v1584_v42, %v1465_v27 }
  0xee   :  { %v523_v0 = vpack.c.bf16 %v517_v54, %v516_v53  ;;  %v410_v8 = vmul.f32 %v409_v37, %v1533_v46  ;;  %v1235_v9 = vpop.eup %1234  ;;  %v489_v26 = vadd.f32 0.4994258, %v488_v5  ;;  %v474_v10 = vadd.f32 0.0036580483, %v473_v63 }
  0xef   :  { %v373_v2 = vmul.f32 %v1235_v9, %v1612_v45  ;;  %v360_v16 = vadd.f32 1.1283791, %v359_v60  ;;  %v450_v19 = vmul.f32 %v449_v12, %v1547_v62  ;;  %v398_v21 = vadd.f32 0.18741608, %v397_v14 }
  0xf0   :  { %603 = vmatmul.bf16.vlgmr.msra.gmra.mxu1 %v523_v0  ;;  %v1643_v13 = vadd.f32 1.0, %v410_v8  ;;  %v490_v40 = vmul.f32 %v489_v26, %v1589_v48  ;;  %v346_v24 = vmul.f32 %v345_v11, %v321_v1  ;;  %v438_v35 = vadd.f32 0.18741608, %v437_v22 }
  0xf1   :  { %v374_v25 = vsub.f32 1.0, %v373_v2  ;;  %v383_v32 = vand.u32 2147483648, %v1612_v45  ;;  %v1649_v33 = vadd.f32 1.0, %v450_v19  ;;  %v475_v42 = vmul.f32 %v474_v10, %v1589_v48 }
  0xf2   :  { %1236 = vrcp.f32 %v1643_v13  ;;  %v1651_v27 = vadd.f32 1.0, %v490_v40  ;;  %vm378_vm12 = vweird.f32 %v1235_v9  ;;  %v381_v34 = vand.u32 2147483647, %v1612_v45 }
  0xf3   :  { %v375_v15 = vmul.f32 %v1235_v9, %v374_v25  ;;  %1238 = vrcp.f32 %v1649_v33  ;;  %v1105_v38 = vclamps-f32 %v346_v24, 1.0  ;;  %vm377_vm13 = vweird.f32 %v1612_v45 }
  0xf4   :  { %1240 = vrcp.f32 %v1651_v27  ;;  %v361_v17 = vmul.f32 %v360_v16, %v1491_v47  ;;  %v399_v44 = vmul.f32 %v398_v21, %v1533_v46  ;;  %vm379_vm14 = vmor %vm377_vm13, %vm378_vm12  ;;  %v384_v43 = vor.u32 1.1754944e-38, %v383_v32 }
  0xf5   :  { %v376_v39 = vadd.f32 %v1235_v9, %v375_v15  ;;  %v439_v28 = vmul.f32 %v438_v35, %v1547_v62  ;;  %v476_v18 = vadd.f32 0.05243302, %v475_v42  ;;  %vm382_vm15 = vcmp.eq.f32.partialorder %v381_v34, 8.507059e+37 }
  0xf6   :  { %v217_v53 = vmul.f32 0.5, %v1461_v23  ;;  %v511_v54 = vadd.f32 1.0, %v1105_v38  ;;  %v218_v47 = vmul.f32 0.5, %v1485_v41  ;;  %v400_v31 = vadd.f32 1.1283791, %v399_v44 }
  0xf7   :  { %v380_v50 = vsel %vm379_vm14, %v1235_v9, %v376_v39  ;;  %v423_v56 = vand.u32 2147483648, %v1643_v13  ;;  %v440_v59 = vadd.f32 1.1283791, %v439_v28  ;;  %v477_v62 = vmul.f32 %v476_v18, %v1589_v48 }
  0xf8   :  { %v1237_v49 = vpop.eup %1236  ;;  %v385_v51 = vsel %vm382_vm15, %v384_v43, %v380_v50  ;;  %v421_v23 = vand.u32 2147483647, %v1643_v13  ;;  %v518_v60 = vmul.f32 %v511_v54, %v217_v53  ;;  %vm417_vm1 = vweird.f32 %v1643_v13 }
  0xf9   :  { %v413_v52 = vmul.f32 %v1237_v49, %v1643_v13  ;;  %v386_v45 = vmul.f32 %v385_v51, %v361_v17  ;;  %v1239_v55 = vpop.eup %1238  ;;  %vm418_vm0 = vweird.f32 %v1237_v49  ;;  %v424_v4 = vor.u32 1.1754944e-38, %v423_v56 }
  0xfa   :  { %v1241_v57 = vpop.eup %1240  ;;  %v453_v63 = vmul.f32 %v1239_v55, %v1649_v33  ;;  %v461_v5 = vand.u32 2147483647, %v1649_v33  ;;  %v463_v14 = vand.u32 2147483648, %v1649_v33  ;;  %vm419_vm2 = vmor %vm417_vm1, %vm418_vm0  ;;  %vm458_vm3 = vweird.f32 %v1239_v55 }
  0xfb   :  { %v414_v46 = vsub.f32 1.0, %v413_v52  ;;  %v1106_v61 = vclamps-f32 %v386_v45, 1.0  ;;  %v493_v30 = vmul.f32 %v1241_v57, %v1651_v27  ;;  %v401_v11 = vmul.f32 %v400_v31, %v1516_v20 }
  0xfc   :  { %v454_v41 = vsub.f32 1.0, %v453_v63  ;;  %vm422_vm4 = vcmp.eq.f32.partialorder %v421_v23, 8.507059e+37  ;;  %vm457_vm5 = vweird.f32 %v1649_v33  ;;  %v441_v2 = vmul.f32 %v440_v59, %v1527_v36 }
  0xfd   :  { %v415_v0 = vmul.f32 %v1237_v49, %v414_v46  ;;  %v512_v37 = vadd.f32 1.0, %v1106_v61  ;;  %v494_v22 = vsub.f32 1.0, %v493_v30  ;;  %v478_v13 = vadd.f32 0.18741608, %v477_v62  ;;  %vm459_vm6 = vmor %vm457_vm5, %vm458_vm3 }
  0xfe   :  { %v455_v9 = vmul.f32 %v1239_v55, %v454_v41  ;;  %v464_v16 = vor.u32 1.1754944e-38, %v463_v14  ;;  %vm462_vm7 = vcmp.eq.f32.partialorder %v461_v5, 8.507059e+37  ;;  %vm497_vm8 = vweird.f32 %v1651_v27  ;;  %v1207_v41 = vld [vmem:[#allocation8 + $0x38] sm:$0xff] }
  0xff   :  { %v416_v3 = vadd.f32 %v1237_v49, %v415_v0  ;;  %v519_v8 = vmul.f32 %v512_v37, %v218_v47  ;;  %v495_v21 = vmul.f32 %v1241_v57, %v494_v22  ;;  %v479_v20 = vmul.f32 %v478_v13, %v1589_v48  ;;  %1003 = vmatpush.bf16.msra.mxu2 %v1207_v41 }
 0x100   :  { %v456_v10 = vadd.f32 %v1239_v55, %v455_v9  ;;  %vm498_vm9 = vweird.f32 %v1241_v57  ;;  %v503_v36 = vand.u32 2147483648, %v1651_v27  ;;  %v501_v15 = vand.u32 2147483647, %v1651_v27 }
 0x101   :  { %v420_v12 = vsel %vm419_vm2, %v1237_v49, %v416_v3  ;;  %v524_v26 = vpack.c.bf16 %v519_v8, %v518_v60  ;;  %v496_v42 = vadd.f32 %v1241_v57, %v495_v21  ;;  %vm499_vm10 = vmor %vm497_vm8, %vm498_vm9  ;;  %v220_v34 = vmul.f32 0.5, %v1521_v29  ;;  %v1205_v21 = vld [vmem:[#allocation8 + $0x28] sm:$0xff] }
 0x102   :  { %v425_v1 = vsel %vm422_vm4, %v424_v4, %v420_v12  ;;  %v460_v40 = vsel %vm459_vm6, %v1239_v55, %v456_v10  ;;  %v480_v38 = vadd.f32 1.1283791, %v479_v20  ;;  %v504_v44 = vor.u32 1.1754944e-38, %v503_v36 }
 0x103   :  { %608 = vmatmul.bf16.gmra.mxu1 %v524_v26  ;;  %v426_v19 = vmul.f32 %v425_v1, %v401_v11  ;;  %v465_v24 = vsel %vm462_vm7, %v464_v16, %v460_v40  ;;  %v500_v17 = vsel %vm499_vm10, %v1241_v57, %v496_v42  ;;  %v219_v48 = vmul.f32 0.5, %v1506_v6  ;;  %v1686_v6 = vld [vmem:[%s1907_s4] ss:$0 sm:$0xff]  ;;  %v1206_v11 = vld [vmem:[#allocation8 + $0x30] sm:$0xff] }
 0x104   :  { %v466_v25 = vmul.f32 %v465_v24, %v441_v2  ;;  %vm502_vm11 = vcmp.eq.f32.partialorder %v501_v15, 8.507059e+37  ;;  %v481_v28 = vmul.f32 %v480_v38, %v1557_v7  ;;  %v221_v53 = vmul.f32 0.5, %v1541_v58  ;;  %1004 = vmatpush.bf16.msra.mxu2 %v1206_v11  ;;  %v1204_v15 = vld [vmem:[#allocation8 + $0x20] sm:$0xff] }
 0x105   :  { %v1107_v35 = vclamps-f32 %v426_v19, 1.0  ;;  %v505_v49 = vsel %vm502_vm11, %v504_v44, %v500_v17 }
 0x106   :  { %v1108_v32 = vclamps-f32 %v466_v25, 1.0  ;;  %v506_v51 = vmul.f32 %v505_v49, %v481_v28  ;;  %v1203_v49 = vld [vmem:[#allocation8 + $0x18] sm:$0xff] }
 0x107   :  { %v513_v39 = vadd.f32 1.0, %v1107_v35 }
 0x108   :  { %v514_v33 = vadd.f32 1.0, %v1108_v32  ;;  %v1109_v52 = vclamps-f32 %v506_v51, 1.0  ;;  %1005 = vmatpush.bf16.msra.mxu2 %v1205_v21 }
 0x109   :  { %v520_v18 = vmul.f32 %v513_v39, %v219_v48 }
 0x10a   :  { %v521_v43 = vmul.f32 %v514_v33, %v220_v34  ;;  %v515_v27 = vadd.f32 1.0, %v1109_v52 }
 0x10c   :  { %v525_v50 = vpack.c.bf16 %v521_v43, %v520_v18  ;;  %v522_v29 = vmul.f32 %v515_v27, %v221_v53  ;;  %1006 = vmatpush.bf16.msra.mxu2 %v1204_v15 }
 0x10e   :  { %v526_v45 = vpack.c.bf16 %v522_v29, %v522_v29 }
 0x110   :  { %1007 = vmatpush.bf16.msra.mxu2 %v1203_v49 }
 0x113   :  { %613 = vmatmul.bf16.gmra.mxu1 %v525_v50 }
 0x123   :  { %618 = vmatmul.bf16.gmra.mxu1 %v526_v45 }
 0x16d   :  { %v604_v54 = vpop.f32.mrf.mxu1 }
 0x16e   :  { %v1689_v55 = vadd.f32 %v1686_v6, %v604_v54 }
 0x170   :  { %v1692_v7 = vmul.f32 0.70710677, %v1689_v55 }
 0x172   :  { %v637_v47 = vmul.f32 %v1692_v7, %v1692_v7 }
 0x174   :  { %v1696_v31 = vmin.f32 %v637_v47, 16.0  ;;  %v1202_v47 = vld [vmem:[#allocation8 + $0x10] sm:$0xff] }
 0x175   :  { %v606_v58 = vpop.f32.mrf.mxu1  ;;  %1008 = vmatpush.bf16.msra.mxu2 %v1202_v47 }
 0x176   :  { %v639_v46 = vmul.f32 2.1237322e-06, %v1696_v31  ;;  %v1700_v56 = vadd.f32 %v1686_v6, %v606_v58  ;;  %v650_v57 = vmul.f32 3.8918573e-05, %v1696_v31 }
 0x178   :  { %v1704_v59 = vmul.f32 0.70710677, %v1700_v56  ;;  %v640_v62 = vadd.f32 0.00028619796, %v639_v46  ;;  %v651_v61 = vadd.f32 0.001143296, %v650_v57 }
 0x17a   :  { %v677_v63 = vmul.f32 %v1704_v59, %v1704_v59  ;;  %v652_v0 = vmul.f32 %v651_v61, %v1696_v31  ;;  %v641_v30 = vmul.f32 %v640_v62, %v1696_v31 }
 0x17c   :  { %v1709_v23 = vmin.f32 %v677_v63, 16.0  ;;  %v653_v37 = vadd.f32 0.014752088, %v652_v0  ;;  %v642_v8 = vadd.f32 0.0036580483, %v641_v30 }
 0x17e   :  { %v679_v60 = vmul.f32 2.1237322e-06, %v1709_v23  ;;  %v690_v3 = vmul.f32 3.8918573e-05, %v1709_v23  ;;  %v654_v4 = vmul.f32 %v653_v37, %v1696_v31  ;;  %v643_v13 = vmul.f32 %v642_v8, %v1696_v31 }
 0x180   :  { %v680_v5 = vadd.f32 0.00028619796, %v679_v60  ;;  %v691_v14 = vadd.f32 0.001143296, %v690_v3  ;;  %v655_v9 = vadd.f32 0.112945676, %v654_v4  ;;  %v609_v26 = vpop.f32.mrf.mxu1 }
 0x181   :  { %v1719_v10 = vadd.f32 %v1686_v6, %v609_v26  ;;  %v644_v35 = vadd.f32 0.05243302, %v643_v13  ;;  %v1201_v3 = vld [vmem:[#allocation8 + $0x8] sm:$0xff] }
 0x182   :  { %v681_v22 = vmul.f32 %v680_v5, %v1709_v23  ;;  %v692_v12 = vmul.f32 %v691_v14, %v1709_v23  ;;  %v656_v1 = vmul.f32 %v655_v9, %v1696_v31  ;;  %1009 = vmatpush.bf16.msra.mxu2 %v1201_v3 }
 0x183   :  { %v1723_v40 = vmul.f32 0.70710677, %v1719_v10  ;;  %v645_v17 = vmul.f32 %v644_v35, %v1696_v31 }
 0x184   :  { %v693_v2 = vadd.f32 0.014752088, %v692_v12  ;;  %v682_v16 = vadd.f32 0.0036580483, %v681_v22  ;;  %v657_v19 = vadd.f32 0.4994258, %v656_v1 }
 0x185   :  { %v717_v20 = vmul.f32 %v1723_v40, %v1723_v40  ;;  %v646_v52 = vadd.f32 0.18741608, %v645_v17 }
 0x186   :  { %v658_v24 = vmul.f32 %v657_v19, %v1696_v31  ;;  %v694_v25 = vmul.f32 %v693_v2, %v1709_v23  ;;  %v683_v32 = vmul.f32 %v682_v16, %v1709_v23  ;;  %v1200_v19 = vld [vmem:[#allocation8] sm:$0xff] }
 0x187   :  { %v1730_v33 = vmin.f32 %v717_v20, 16.0  ;;  %v647_v0 = vmul.f32 %v646_v52, %v1696_v31  ;;  %1010 = vmatpush.bf16.msra.mxu2 %v1200_v19 }
 0x188   :  { %v659_v42 = vadd.f32 1.0, %v658_v24  ;;  %v695_v36 = vadd.f32 0.112945676, %v694_v25  ;;  %v611_v34 = vpop.f32.mrf.mxu1  ;;  %v684_v44 = vadd.f32 0.05243302, %v683_v32 }
 0x189   :  { %v1733_v38 = vadd.f32 %v1686_v6, %v611_v34  ;;  %v730_v48 = vmul.f32 3.8918573e-05, %v1730_v33  ;;  %v719_v45 = vmul.f32 2.1237322e-06, %v1730_v33  ;;  %v648_v22 = vadd.f32 1.1283791, %v647_v0 }
 0x18a   :  { %1242 = vrcp.f32 %v659_v42  ;;  %v696_v39 = vmul.f32 %v695_v36, %v1709_v23  ;;  %v685_v27 = vmul.f32 %v684_v44, %v1709_v23  ;;  %v671_v37 = vand.u32 2147483648, %v659_v42 }
 0x18b   :  { %v1739_v43 = vmul.f32 0.70710677, %v1733_v38  ;;  %v731_v18 = vadd.f32 0.001143296, %v730_v48  ;;  %v720_v60 = vadd.f32 0.00028619796, %v719_v45  ;;  %vm665_vm13 = vweird.f32 %v659_v42 }
 0x18c   :  { %v697_v28 = vadd.f32 0.4994258, %v696_v39  ;;  %v686_v30 = vadd.f32 0.18741608, %v685_v27  ;;  %v669_v14 = vand.u32 2147483647, %v659_v42  ;;  %v649_v36 = vmul.f32 %v648_v22, %v1692_v7 }
 0x18d   :  { %v757_v50 = vmul.f32 %v1739_v43, %v1739_v43  ;;  %v732_v29 = vmul.f32 %v731_v18, %v1730_v33  ;;  %v672_v26 = vor.u32 1.1754944e-38, %v671_v37  ;;  %v721_v13 = vmul.f32 %v720_v60, %v1730_v33 }
 0x18e   :  { %v698_v53 = vmul.f32 %v697_v28, %v1709_v23  ;;  %v687_v2 = vmul.f32 %v686_v30, %v1709_v23  ;;  %vm670_vm15 = vcmp.eq.f32.partialorder %v669_v14, 8.507059e+37 }
 0x18f   :  { %v1747_v54 = vmin.f32 %v757_v50, 16.0  ;;  %v733_v62 = vadd.f32 0.014752088, %v732_v29  ;;  %v722_v17 = vadd.f32 0.0036580483, %v721_v13 }
 0x190   :  { %v1243_v51 = vpop.eup %1242  ;;  %v614_v46 = vpop.f32.mrf.mxu1  ;;  %v1749_v57 = vadd.f32 1.0, %v698_v53  ;;  %v688_v39 = vadd.f32 1.1283791, %v687_v2 }
 0x191   :  { %v661_v58 = vmul.f32 %v1243_v51, %v659_v42  ;;  %v1752_v61 = vadd.f32 %v1686_v6, %v614_v46  ;;  %v759_v41 = vmul.f32 2.1237322e-06, %v1747_v54  ;;  %vm666_vm12 = vweird.f32 %v1243_v51 }
 0x192   :  { %1244 = vrcp.f32 %v1749_v57  ;;  %v734_v8 = vmul.f32 %v733_v62, %v1730_v33  ;;  %v770_v31 = vmul.f32 3.8918573e-05, %v1747_v54  ;;  %vm1764_vm14 = vmor %vm665_vm13, %vm666_vm12  ;;  %v711_v7 = vand.u32 2147483648, %v1749_v57 }
 0x193   :  { %v662_v63 = vsub.f32 1.0, %v661_v58  ;;  %v1758_v5 = vmul.f32 0.70710677, %v1752_v61  ;;  %v760_v16 = vadd.f32 0.00028619796, %v759_v41  ;;  %v689_v45 = vmul.f32 %v688_v39, %v1704_v59 }
 0x194   :  { %v735_v1 = vadd.f32 0.112945676, %v734_v8  ;;  %v771_v23 = vadd.f32 0.001143296, %v770_v31  ;;  %v723_v47 = vmul.f32 %v722_v17, %v1730_v33  ;;  %vm705_vm1 = vweird.f32 %v1749_v57 }
 0x195   :  { %v663_v4 = vmul.f32 %v1243_v51, %v662_v63  ;;  %v797_v11 = vmul.f32 %v1758_v5, %v1758_v5  ;;  %v761_v44 = vmul.f32 %v760_v16, %v1747_v54  ;;  %v712_v37 = vor.u32 1.1754944e-38, %v711_v7 }
 0x196   :  { %v736_v20 = vmul.f32 %v735_v1, %v1730_v33  ;;  %v772_v52 = vmul.f32 %v771_v23, %v1747_v54  ;;  %v624_v16 = vmul.f32 0.5, %v1700_v56 }
 0x197   :  { %v664_v9 = vadd.f32 %v1243_v51, %v663_v4  ;;  %v1773_v35 = vmin.f32 %v797_v11, 16.0  ;;  %v762_v58 = vadd.f32 0.0036580483, %v761_v44 }
 0x198   :  { %v1245_v24 = vpop.eup %1244  ;;  %v616_v25 = vpop.f32.mrf.mxu1  ;;  %v737_v34 = vadd.f32 0.4994258, %v736_v20  ;;  %v773_v60 = vadd.f32 0.014752088, %v772_v52 }
 0x199   :  { %v668_v21 = vsel %vm1764_vm14, %v1243_v51, %v664_v9  ;;  %v1776_v32 = vadd.f32 %v1686_v6, %v616_v25  ;;  %v701_v15 = vmul.f32 %v1245_v24, %v1749_v57  ;;  %v799_v50 = vmul.f32 2.1237322e-06, %v1773_v35 }
 0x19a   :  { %v673_v42 = vsel %vm670_vm15, %v672_v26, %v668_v21  ;;  %v738_v18 = vmul.f32 %v737_v34, %v1730_v33  ;;  %v709_v51 = vand.u32 2147483647, %v1749_v57  ;;  %vm706_vm0 = vweird.f32 %v1245_v24 }
 0x19b   :  { %v1782_v48 = vmul.f32 0.70710677, %v1776_v32  ;;  %v674_v49 = vmul.f32 %v673_v42, %v649_v36  ;;  %v702_v28 = vsub.f32 1.0, %v701_v15  ;;  %vm707_vm2 = vmor %vm705_vm1, %vm706_vm0  ;;  %v800_v41 = vadd.f32 0.00028619796, %v799_v50 }
 0x19c   :  { %v1791_v29 = vadd.f32 1.0, %v738_v18  ;;  %vm710_vm3 = vcmp.eq.f32.partialorder %v709_v51, 8.507059e+37  ;;  %v810_v3 = vmul.f32 3.8918573e-05, %v1773_v35  ;;  %v724_v57 = vadd.f32 0.05243302, %v723_v47 }
 0x19d   :  { %v837_v27 = vmul.f32 %v1782_v48, %v1782_v48  ;;  %v703_v53 = vmul.f32 %v1245_v24, %v702_v28  ;;  %v1142_v62 = vclamps-f32 %v674_v49, 1.0  ;;  %v763_v8 = vmul.f32 %v762_v58, %v1747_v54 }
 0x19e   :  { %1246 = vrcp.f32 %v1791_v29  ;;  %v774_v11 = vmul.f32 %v773_v60, %v1747_v54  ;;  %v801_v26 = vmul.f32 %v800_v41, %v1773_v35  ;;  %v811_v13 = vadd.f32 0.001143296, %v810_v3 }
 0x19f   :  { %v704_v63 = vadd.f32 %v1245_v24, %v703_v53  ;;  %v1797_v0 = vmin.f32 %v837_v27, 16.0  ;;  %v917_v31 = vadd.f32 1.0, %v1142_v62  ;;  %v725_v19 = vmul.f32 %v724_v57, %v1730_v33 }
 0x1a0   :  { %v619_v46 = vpop.f32.mrf.mxu1  ;;  %v775_v21 = vadd.f32 0.112945676, %v774_v11  ;;  %v812_v23 = vmul.f32 %v811_v13, %v1773_v35  ;;  %v802_v17 = vadd.f32 0.0036580483, %v801_v26  ;;  %vm745_vm5 = vweird.f32 %v1791_v29 }
 0x1a1   :  { %v1800_v30 = vadd.f32 %v1686_v6, %v619_v46  ;;  %v708_v59 = vsel %vm707_vm2, %v1245_v24, %v704_v63  ;;  %v623_v6 = vmul.f32 0.5, %v1689_v55  ;;  %v839_v22 = vmul.f32 2.1237322e-06, %v1797_v0 }
 0x1a2   :  { %v713_v14 = vsel %vm710_vm3, %v712_v37, %v708_v59  ;;  %v764_v24 = vadd.f32 0.05243302, %v763_v8  ;;  %v776_v34 = vmul.f32 %v775_v21, %v1747_v54  ;;  %v850_v39 = vmul.f32 3.8918573e-05, %v1797_v0 }
 0x1a3   :  { %v1804_v4 = vmul.f32 0.70710677, %v1800_v30  ;;  %v714_v9 = vmul.f32 %v713_v14, %v689_v45  ;;  %v924_v42 = vmul.f32 %v917_v31, %v623_v6  ;;  %v840_v36 = vadd.f32 0.00028619796, %v839_v22 }
 0x1a4   :  { %v1810_v12 = vpop.eup %1246  ;;  %v813_v49 = vadd.f32 0.014752088, %v812_v23  ;;  %v777_v28 = vadd.f32 0.4994258, %v776_v34  ;;  %v851_v18 = vadd.f32 0.001143296, %v850_v39  ;;  %v765_v51 = vmul.f32 %v764_v24, %v1747_v54 }
 0x1a5   :  { %v877_v1 = vmul.f32 %v1804_v4, %v1804_v4  ;;  %v1143_v2 = vclamps-f32 %v714_v9, 1.0  ;;  %v741_v55 = vmul.f32 %v1810_v12, %v1791_v29  ;;  %v726_v50 = vadd.f32 0.18741608, %v725_v19 }
 0x1a6   :  { %v814_v52 = vmul.f32 %v813_v49, %v1773_v35  ;;  %v841_v27 = vmul.f32 %v840_v36, %v1797_v0  ;;  %v778_v45 = vmul.f32 %v777_v28, %v1747_v54  ;;  %v852_v47 = vmul.f32 %v851_v18, %v1797_v0 }
 0x1a7   :  { %v918_v20 = vadd.f32 1.0, %v1143_v2  ;;  %v742_v15 = vsub.f32 1.0, %v741_v55  ;;  %v1822_v56 = vmin.f32 %v877_v1, 16.0  ;;  %v803_v58 = vmul.f32 %v802_v17, %v1773_v35 }
 0x1a8   :  { %v621_v25 = vpop.f32.mrf.mxu1  ;;  %v815_v46 = vadd.f32 0.112945676, %v814_v52  ;;  %v1833_v37 = vadd.f32 1.0, %v778_v45  ;;  %v853_v60 = vadd.f32 0.014752088, %v852_v47  ;;  %v727_v41 = vmul.f32 %v726_v50, %v1730_v33 }
 0x1a9   :  { %v925_v44 = vmul.f32 %v918_v20, %v624_v16  ;;  %v743_v53 = vmul.f32 %v1810_v12, %v742_v15  ;;  %v890_v62 = vmul.f32 3.8918573e-05, %v1822_v56  ;;  %v879_v63 = vmul.f32 2.1237322e-06, %v1822_v56 }
 0x1aa   :  { %v766_v59 = vadd.f32 0.18741608, %v765_v51  ;;  %v816_v3 = vmul.f32 %v815_v46, %v1773_v35  ;;  %v842_v14 = vadd.f32 0.0036580483, %v841_v27  ;;  %vm746_vm4 = vweird.f32 %v1810_v12 }
 0x1ab   :  { %v931_v7 = vpack.c.bf16 %v925_v44, %v924_v42  ;;  %v891_v57 = vadd.f32 0.001143296, %v890_v62  ;;  %v744_v8 = vadd.f32 %v1810_v12, %v743_v53  ;;  %1248 = vrcp.f32 %v1833_v37  ;;  %vm747_vm6 = vmor %vm745_vm5, %vm746_vm4 }
 0x1ac   :  { %v804_v9 = vadd.f32 0.05243302, %v803_v58  ;;  %v751_v31 = vand.u32 2147483648, %v1791_v29  ;;  %v817_v6 = vadd.f32 0.4994258, %v816_v3  ;;  %v854_v11 = vmul.f32 %v853_v60, %v1797_v0 }
 0x1ad   :  { %1011 = vmatmul.bf16.vlgmr.msra.gmra.mxu2 %v931_v7  ;;  %v880_v22 = vadd.f32 0.00028619796, %v879_v63  ;;  %v749_v33 = vand.u32 2147483647, %v1791_v29  ;;  %v892_v26 = vmul.f32 %v891_v57, %v1822_v56  ;;  %v728_v1 = vadd.f32 1.1283791, %v727_v41 }
 0x1ae   :  { %v767_v2 = vmul.f32 %v766_v59, %v1747_v54  ;;  %v818_v13 = vmul.f32 %v817_v6, %v1773_v35  ;;  %v843_v16 = vmul.f32 %v842_v14, %v1797_v0  ;;  %v748_v19 = vsel %vm747_vm6, %v1810_v12, %v744_v8 }
 0x1af   :  { %v855_v55 = vadd.f32 0.112945676, %v854_v11  ;;  %v893_v21 = vadd.f32 0.014752088, %v892_v26  ;;  %v805_v24 = vmul.f32 %v804_v9, %v1773_v35  ;;  %v752_v25 = vor.u32 1.1754944e-38, %v751_v31 }
 0x1b0   :  { %v1850_v29 = vadd.f32 1.0, %v818_v13  ;;  %v881_v42 = vmul.f32 %v880_v22, %v1822_v56  ;;  %vm750_vm7 = vcmp.eq.f32.partialorder %v749_v33, 8.507059e+37  ;;  %v729_v12 = vmul.f32 %v728_v1, %v1723_v40 }
 0x1b1   :  { %v1249_v20 = vpop.eup %1248  ;;  %v856_v54 = vmul.f32 %v855_v55, %v1797_v0  ;;  %v894_v23 = vmul.f32 %v893_v21, %v1822_v56  ;;  %v753_v36 = vsel %vm750_vm7, %v752_v25, %v748_v19  ;;  %v768_v34 = vadd.f32 1.1283791, %v767_v2 }
 0x1b2   :  { %v781_v15 = vmul.f32 %v1249_v20, %v1833_v37  ;;  %1250 = vrcp.f32 %v1850_v29  ;;  %v844_v39 = vadd.f32 0.05243302, %v843_v16  ;;  %v806_v44 = vadd.f32 0.18741608, %v805_v24 }
 0x1b3   :  { %v857_v17 = vadd.f32 0.4994258, %v856_v54  ;;  %v895_v28 = vadd.f32 0.112945676, %v894_v23  ;;  %v882_v18 = vadd.f32 0.0036580483, %v881_v42  ;;  %v754_v50 = vmul.f32 %v753_v36, %v729_v12 }
 0x1b4   :  { %v782_v49 = vsub.f32 1.0, %v781_v15  ;;  %v791_v51 = vand.u32 2147483648, %v1833_v37  ;;  %vm786_vm8 = vweird.f32 %v1249_v20  ;;  %v789_v27 = vand.u32 2147483647, %v1833_v37 }
 0x1b5   :  { %v858_v7 = vmul.f32 %v857_v17, %v1797_v0  ;;  %v896_v53 = vmul.f32 %v895_v28, %v1822_v56  ;;  %v769_v40 = vmul.f32 %v768_v34, %v1739_v43  ;;  %v845_v45 = vmul.f32 %v844_v39, %v1797_v0 }
 0x1b6   :  { %v783_v52 = vmul.f32 %v1249_v20, %v782_v49  ;;  %v807_v46 = vmul.f32 %v806_v44, %v1773_v35  ;;  %vm785_vm9 = vweird.f32 %v1833_v37  ;;  %v883_v60 = vmul.f32 %v882_v18, %v1822_v56 }
 0x1b7   :  { %v1864_v47 = vadd.f32 1.0, %v858_v7  ;;  %v897_v63 = vadd.f32 0.4994258, %v896_v53  ;;  %vm787_vm10 = vmor %vm785_vm9, %vm786_vm8  ;;  %v792_v41 = vor.u32 1.1754944e-38, %v791_v51  ;;  %v1144_v43 = vclamps-f32 %v754_v50, 1.0 }
 0x1b8   :  { %v1251_v58 = vpop.eup %1250  ;;  %v784_v62 = vadd.f32 %v1249_v20, %v783_v52  ;;  %vm790_vm11 = vcmp.eq.f32.partialorder %v789_v27, 8.507059e+37  ;;  %v846_v14 = vadd.f32 0.18741608, %v845_v45  ;;  %v808_v9 = vadd.f32 1.1283791, %v807_v46 }
 0x1b9   :  { %v821_v59 = vmul.f32 %v1251_v58, %v1850_v29  ;;  %1252 = vrcp.f32 %v1864_v47  ;;  %v898_v57 = vmul.f32 %v897_v63, %v1822_v56  ;;  %v831_v37 = vand.u32 2147483648, %v1850_v29 }
 0x1ba   :  { %v788_v3 = vsel %vm787_vm10, %v1249_v20, %v784_v62  ;;  %v884_v22 = vadd.f32 0.05243302, %v883_v60  ;;  %vm826_vm12 = vweird.f32 %v1251_v58  ;;  %v829_v11 = vand.u32 2147483647, %v1850_v29 }
 0x1bb   :  { %v793_v8 = vsel %vm790_vm11, %v792_v41, %v788_v3  ;;  %v822_v35 = vsub.f32 1.0, %v821_v59  ;;  %v1873_v6 = vadd.f32 1.0, %v898_v57  ;;  %v919_v1 = vadd.f32 1.0, %v1144_v43 }
 0x1bc   :  { %v794_v31 = vmul.f32 %v793_v8, %v769_v40  ;;  %v625_v13 = vmul.f32 0.5, %v1719_v10  ;;  %v847_v16 = vmul.f32 %v846_v14, %v1797_v0  ;;  %vm825_vm13 = vweird.f32 %v1850_v29 }
 0x1bd   :  { %v823_v33 = vmul.f32 %v1251_v58, %v822_v35  ;;  %1254 = vrcp.f32 %v1873_v6  ;;  %v626_v55 = vmul.f32 0.5, %v1733_v38  ;;  %vm827_vm14 = vmor %vm825_vm13, %vm826_vm12  ;;  %v832_v24 = vor.u32 1.1754944e-38, %v831_v37 }
 0x1be   :  { %v1145_v26 = vclamps-f32 %v794_v31, 1.0  ;;  %v809_v20 = vmul.f32 %v808_v9, %v1758_v5  ;;  %v885_v42 = vmul.f32 %v884_v22, %v1822_v56  ;;  %vm830_vm15 = vcmp.eq.f32.partialorder %v829_v11, 8.507059e+37 }
 0x1bf   :  { %v1253_v2 = vpop.eup %1252  ;;  %v824_v19 = vadd.f32 %v1251_v58, %v823_v33  ;;  %v926_v23 = vmul.f32 %v919_v1, %v625_v13  ;;  %v848_v15 = vadd.f32 1.1283791, %v847_v16  ;;  %v869_v29 = vand.u32 2147483647, %v1864_v47 }
 0x1c0   :  { %v920_v21 = vadd.f32 1.0, %v1145_v26  ;;  %v861_v25 = vmul.f32 %v1253_v2, %v1864_v47  ;;  %v871_v38 = vand.u32 2147483648, %v1864_v47  ;;  %vm866_vm0 = vweird.f32 %v1253_v2 }
 0x1c1   :  { %v828_v54 = vsel %vm827_vm14, %v1251_v58, %v824_v19  ;;  %v886_v44 = vadd.f32 0.18741608, %v885_v42  ;;  %vm865_vm1 = vweird.f32 %v1864_v47  ;;  %v849_v50 = vmul.f32 %v848_v15, %v1782_v48 }
 0x1c2   :  { %v927_v10 = vmul.f32 %v920_v21, %v626_v55  ;;  %v833_v36 = vsel %vm830_vm15, %v832_v24, %v828_v54  ;;  %v862_v0 = vsub.f32 1.0, %v861_v25  ;;  %vm867_vm2 = vmor %vm865_vm1, %vm866_vm0  ;;  %v872_v28 = vor.u32 1.1754944e-38, %v871_v38 }
 0x1c3   :  { %v1255_v12 = vpop.eup %1254  ;;  %v834_v39 = vmul.f32 %v833_v36, %v809_v20  ;;  %vm870_vm3 = vcmp.eq.f32.partialorder %v869_v29, 8.507059e+37  ;;  %v887_v53 = vmul.f32 %v886_v44, %v1822_v56  ;;  %v911_v58 = vand.u32 2147483648, %v1873_v6 }
 0x1c4   :  { %v932_v34 = vpack.c.bf16 %v927_v10, %v926_v23  ;;  %v863_v17 = vmul.f32 %v1253_v2, %v862_v0  ;;  %v901_v5 = vmul.f32 %v1255_v12, %v1873_v6  ;;  %vm906_vm4 = vweird.f32 %v1255_v12 }
 0x1c5   :  { %v1146_v51 = vclamps-f32 %v834_v39, 1.0  ;;  %vm905_vm5 = vweird.f32 %v1873_v6  ;;  %v909_v47 = vand.u32 2147483647, %v1873_v6  ;;  %v627_v48 = vmul.f32 0.5, %v1752_v61 }
 0x1c6   :  { %1016 = vmatmul.bf16.gmra.mxu2 %v932_v34  ;;  %v864_v49 = vadd.f32 %v1253_v2, %v863_v17  ;;  %v902_v18 = vsub.f32 1.0, %v901_v5  ;;  %vm907_vm6 = vmor %vm905_vm5, %vm906_vm4  ;;  %v628_v63 = vmul.f32 0.5, %v1776_v32  ;;  %v888_v60 = vadd.f32 1.1283791, %v887_v53  ;;  %v1227_v32 = vld [vmem:[%s1909_s6] ss:$0 sm:$0xff] }
 0x1c7   :  { %v921_v62 = vadd.f32 1.0, %v1146_v51  ;;  %v912_v56 = vor.u32 1.1754944e-38, %v911_v58  ;;  %vm910_vm7 = vcmp.eq.f32.partialorder %v909_v47, 8.507059e+37  ;;  %v629_v61 = vmul.f32 0.5, %v1800_v30  ;;  %s1042_s6 = sshll.u32 %s1390_s23, 4  ;;  %s1043_s6 = int_to_ptr.vmem [resolvable:$true] %s1042_s6 }
 0x1c8   :  { %v868_v7 = vsel %vm867_vm2, %v1253_v2, %v864_v49  ;;  %v903_v27 = vmul.f32 %v1255_v12, %v902_v18  ;;  %v889_v14 = vmul.f32 %v888_v60, %v1804_v4 }
 0x1c9   :  { %v873_v52 = vsel %vm870_vm3, %v872_v28, %v868_v7  ;;  %v928_v43 = vmul.f32 %v921_v62, %v627_v48 }
 0x1ca   :  { %v874_v40 = vmul.f32 %v873_v52, %v849_v50  ;;  %v904_v45 = vadd.f32 %v1255_v12, %v903_v27 }
 0x1cc   :  { %v1147_v46 = vclamps-f32 %v874_v40, 1.0  ;;  %v908_v59 = vsel %vm907_vm6, %v1255_v12, %v904_v45 }
 0x1cd   :  { %v913_v57 = vsel %vm910_vm7, %v912_v56, %v908_v59 }
 0x1ce   :  { %v922_v41 = vadd.f32 1.0, %v1147_v46  ;;  %v914_v35 = vmul.f32 %v913_v57, %v889_v14 }
 0x1d0   :  { %v929_v3 = vmul.f32 %v922_v41, %v628_v63  ;;  %v1148_v9 = vclamps-f32 %v914_v35, 1.0 }
 0x1d2   :  { %v933_v8 = vpack.c.bf16 %v929_v3, %v928_v43  ;;  %v923_v31 = vadd.f32 1.0, %v1148_v9 }
 0x1d4   :  { %v930_v37 = vmul.f32 %v923_v31, %v629_v61 }
 0x1d6   :  { %1021 = vmatmul.bf16.gmra.mxu2 %v933_v8  ;;  %v934_v6 = vpack.c.bf16 %v930_v37, %v930_v37 }
 0x1e6   :  { %1026 = vmatmul.bf16.gmra.mxu2 %v934_v6 }
 0x230   :  { %v1012_v22 = vpop.f32.mrf.mxu2 }
 0x231   :  { %v1013_v33 = vadd.f32 %v1227_v32, %v1012_v22 }
 0x233   :  { %1031 = vst [vmem:[#allocation10] sm:$0xff] %v1013_v33 }
 0x238   :  { %v1014_v11 = vpop.f32.mrf.mxu2 }
 0x239   :  { %v1015_v26 = vadd.f32 %v1227_v32, %v1014_v11 }
 0x23b   :  { %1032 = vst [vmem:[#allocation10 + $0x8] sm:$0xff] %v1015_v26 }
 0x249   :  { %v1017_v4 = vpop.f32.mrf.mxu2 }
 0x24a   :  { %v1018_v1 = vadd.f32 %v1227_v32, %v1017_v4 }
 0x24c   :  { %1033 = vst [vmem:[#allocation10 + $0x10] sm:$0xff] %v1018_v1 }
 0x251   :  { %v1019_v2 = vpop.f32.mrf.mxu2 }
 0x252   :  { %v1020_v13 = vadd.f32 %v1227_v32, %v1019_v2 }
 0x254   :  { %1034 = vst [vmem:[#allocation10 + $0x18] sm:$0xff] %v1020_v13 }
 0x259   :  { %v1022_v30 = vpop.f32.mrf.mxu2 }
 0x25a   :  { %v1023_v16 = vadd.f32 %v1227_v32, %v1022_v30 }
 0x25c   :  { %1035 = vst [vmem:[#allocation10 + $0x20] sm:$0xff] %v1023_v16 }
 0x261   :  { %v1024_v19 = vpop.f32.mrf.mxu2 }
 0x262   :  { %v1025_v55 = vadd.f32 %v1227_v32, %v1024_v19 }
 0x264   :  { %1036 = vst [vmem:[#allocation10 + $0x28] sm:$0xff] %v1025_v55 }
 0x269   :  { %v1027_v21 = vpop.f32.mrf.mxu2 }
 0x26a   :  { %v1028_v24 = vadd.f32 %v1227_v32, %v1027_v21 }
 0x26c   :  { %1037 = vst [vmem:[#allocation10 + $0x30] sm:$0xff] %v1028_v24 }
 0x26d   :  { %1050 = dma.vmem_to_hbm [thread:$0]  %s1043_s6, 896, %s1045_s26, [#allocation4], %s1391_s27, %s1391_s27, %s1392_s28  }
 0x271   :  { %v1029_v25 = vpop.f32.mrf.mxu2 }
 0x272   :  { %1382 = dma.done.wait [#allocation4], 896  }
 0x273   :  { %1383 = vsyncadd [#allocation4], 4294966400 }
 0x274   :  { %1055 = vsyncpa [#allocation3], 1 }
 0x275   :  { %1056 = vsyncpa [#allocation6], 1 }
 0x276   :  { %1057 = vsyncpa [#allocation9], 1 }
 0x277   :  { %1058 = vsyncpa [#allocation4], 1 }

</bundles_post_ra>
